<compile_context>
chip_gen: v6e
topology: v6e:2x2x1
jax: 0.10.0
libtpu: 0.0.40
codegen_flags: <defaults>
</compile_context>

<pallas_src>
import functools
import math

import jax
import jax.numpy as jnp
from jax.experimental import pallas as pl
from jax.experimental.pallas import tpu as pltpu


# ---------------------------------------------------------------------------
# Tiling helpers
# ---------------------------------------------------------------------------

def _sublane_multiple(dtype) -> int:
    itemsize = jnp.dtype(dtype).itemsize
    return {4: 8, 2: 16, 1: 32}.get(itemsize, 8)


def _round_up(x: int, m: int) -> int:
    return ((x + m - 1) // m) * m


def _cdiv(a: int, b: int) -> int:
    return -(-a // b)


def _pick_tile(dim: int, cap: int, mult: int):
    """Tile size <= ~cap, multiple of `mult`, minimizing padded work."""
    dim_r = _round_up(max(dim, 1), mult)
    n_tiles = max(1, _cdiv(dim_r, cap))
    tile = _round_up(_cdiv(dim_r, n_tiles), mult)
    dim_p = _round_up(dim_r, tile)
    return tile, dim_p


def _vmem_limit_bytes() -> int:
    """Per-generation scoped-VMEM limit with headroom (v7x ~54 MiB, v5e/v6e ~108 MiB)."""
    default = 64 * 1024 * 1024
    try:
        cap = getattr(pltpu.get_tpu_info(), "vmem_capacity_bytes", None)
    except Exception:
        cap = None
    if not cap:
        return default
    return int(min(cap * 0.85, 112 * 1024 * 1024))


# ---------------------------------------------------------------------------
# Kernels
# ---------------------------------------------------------------------------

def _linear_kernel(x_ref, w_ref, b_ref, o_ref, *, mxu_dtype):
    """Fast path: single K block (no reduction axis), bias fused in the epilogue."""
    x = x_ref[...]
    w = w_ref[...]
    if mxu_dtype is not None:
        x = x.astype(mxu_dtype)
        w = w.astype(mxu_dtype)
    acc = jnp.dot(x, w, preferred_element_type=jnp.float32)
    o_ref[...] = (acc + b_ref[...].astype(jnp.float32)).astype(o_ref.dtype)


def _linear_acc_kernel(x_ref, w_ref, b_ref, o_ref, acc_ref, *, mxu_dtype):
    """K-reduction path: f32 VMEM accumulator, bias added exactly once at k==last."""
    k = pl.program_id(3)

    @pl.when(k == 0)
    def _():
        acc_ref[...] = jnp.zeros_like(acc_ref)

    x = x_ref[...]
    w = w_ref[...]
    if mxu_dtype is not None:
        x = x.astype(mxu_dtype)
        w = w.astype(mxu_dtype)
    acc_ref[...] += jnp.dot(x, w, preferred_element_type=jnp.float32)

    @pl.when(k == pl.num_programs(3) - 1)
    def _():
        o_ref[...] = (acc_ref[...] + b_ref[...].astype(jnp.float32)).astype(o_ref.dtype)


def _ensemble_matmul(x_p, w_p, b_p, *, tm, tk, tn, out_dtype, mxu_dtype=None):
    """
    x_p : (E, B_pad, K_pad)  padded activations (padded per call)
    w_p : (E, K_pad, N_pad)  padded weights (padded once at init)
    b_p : (E, 1, N_pad)      padded bias
    returns (E, B_pad, N_pad) in out_dtype
    """
    E, B_pad, K_pad = x_p.shape
    _, _, N_pad = w_p.shape
    gm, gn, gk = B_pad // tm, N_pad // tn, K_pad // tk

    cost = pl.CostEstimate(
        flops=2 * E * B_pad * K_pad * N_pad,
        transcendentals=0,
        bytes_accessed=(
            x_p.size * x_p.dtype.itemsize
            + w_p.size * w_p.dtype.itemsize
            + b_p.size * b_p.dtype.itemsize
            + E * B_pad * N_pad * jnp.dtype(out_dtype).itemsize
        ),
    )

    if gk == 1:
        # Fast path: no K grid axis, no accumulator scratch, single store pass.
        grid = (E, gm, gn)
        kernel = functools.partial(_linear_kernel, mxu_dtype=mxu_dtype)
        in_specs = [
            pl.BlockSpec((None, tm, tk), lambda e, m, n: (e, m, 0)),
            pl.BlockSpec((None, tk, tn), lambda e, m, n: (e, 0, n)),
            pl.BlockSpec((None, 1, tn), lambda e, m, n: (e, 0, n)),
        ]
        out_spec = pl.BlockSpec((None, tm, tn), lambda e, m, n: (e, m, n))
        scratch = []
        dims = ("parallel", "parallel", "parallel")
    else:
        grid = (E, gm, gn, gk)
        kernel = functools.partial(_linear_acc_kernel, mxu_dtype=mxu_dtype)
        in_specs = [
            pl.BlockSpec((None, tm, tk), lambda e, m, n, k: (e, m, k)),
            pl.BlockSpec((None, tk, tn), lambda e, m, n, k: (e, k, n)),
            pl.BlockSpec((None, 1, tn), lambda e, m, n, k: (e, 0, n)),
        ]
        out_spec = pl.BlockSpec((None, tm, tn), lambda e, m, n, k: (e, m, n))
        scratch = [pltpu.VMEM((tm, tn), jnp.float32)]
        dims = ("parallel", "parallel", "parallel", "arbitrary")

    return pl.pallas_call(
        kernel,
        out_shape=jax.ShapeDtypeStruct((E, B_pad, N_pad), out_dtype),
        grid_spec=pltpu.PrefetchScalarGridSpec(
            num_scalar_prefetch=0,
            grid=grid,
            in_specs=in_specs,
            out_specs=out_spec,
            scratch_shapes=scratch,
        ),
        compiler_params=pltpu.CompilerParams(
            dimension_semantics=dims,
            vmem_limit_bytes=_vmem_limit_bytes(),
        ),
        cost_estimate=cost,
    )(x_p, w_p, b_p)


# ---------------------------------------------------------------------------
# Module
# ---------------------------------------------------------------------------

class Linear:
    """Ensemble-ready affine transformation y = x @ W + b (Pallas TPU)."""

    def __init__(self, config, in_features, out_features, bias=True,
                 init_multiplier=1.0, key=None,
                 tm_cap=512, tn_cap=512, tk_cap=2048):
        self.ensemble_shape = tuple(config["ensemble_shape"])
        self.in_features = int(in_features)
        self.out_features = int(out_features)
        self.dtype = config["float_dtype"]
        # Optional: feed the MXU bf16 tiles (f32 accumulation kept). Off by
        # default to preserve exact forward semantics.
        self.mxu_dtype = config.get("mxu_dtype", None)
        self._tm_cap, self._tn_cap, self._tk_cap = tm_cap, tn_cap, tk_cap

        if key is None:
            key = jax.random.PRNGKey(0)
        # Matches the PyTorch init: normal(std=out_features**-0.5) * init_multiplier.
        self.weight = (
            jax.random.normal(
                key, self.ensemble_shape + (in_features, out_features), dtype=self.dtype
            )
            * (out_features ** -0.5)
            * init_multiplier
        )
        self.bias = (
            jnp.zeros(self.ensemble_shape + (out_features,), dtype=self.dtype)
            if bias
            else None
        )
        self.refresh_parameters()

    # ------------------------------------------------------------------
    def refresh_parameters(self):
        """(Re)build padded parameter copies. Call after mutating weight/bias.

        Padding the (largest) parameter tensors happens once here, not on
        every forward call.
        """
        E = math.prod(self.ensemble_shape) if self.ensemble_shape else 1
        K, N = self.in_features, self.out_features

        self._tk, self._K_pad = _pick_tile(K, self._tk_cap, 128)
        self._tn, self._N_pad = _pick_tile(N, self._tn_cap, 128)

        w = self.weight.reshape(E, K, N)
        b = (self.bias.reshape(E, N) if self.bias is not None
             else jnp.zeros((E, N), dtype=self.weight.dtype))

        # Ensemble-input layout: (E, K_pad, N_pad) / (E, 1, N_pad)
        self._w_ens = jnp.pad(w, ((0, 0), (0, self._K_pad - K), (0, self._N_pad - N)))
        self._b_ens = jnp.pad(b, ((0, 0), (0, self._N_pad - N))).reshape(E, 1, self._N_pad)

        # Shared-input layout: fold E into the output axis, so shared
        # activations run ONE wide (B,K)@(K,E*N) matmul instead of E small
        # ones (no E-fold redundant x DMA, better MXU row utilization).
        EN = E * N
        self._tn_s, self._EN_pad = _pick_tile(EN, self._tn_cap, 128)
        w_shared = jnp.transpose(w, (1, 0, 2)).reshape(K, EN)
        self._w_shared = jnp.pad(
            w_shared, ((0, self._K_pad - K), (0, self._EN_pad - EN))
        ).reshape(1, self._K_pad, self._EN_pad)
        self._b_shared = jnp.pad(
            b.reshape(1, EN), ((0, 0), (0, self._EN_pad - EN))
        ).reshape(1, 1, self._EN_pad)

        self._E = E

    # ------------------------------------------------------------------
    def __call__(self, features):
        ensemble_shape = self.ensemble_shape
        ensemble_dim = len(ensemble_shape)
        ensemble_input = tuple(features.shape[:ensemble_dim]) == ensemble_shape
        E, K, N = self._E, self.in_features, self.out_features

        if ensemble_input:
            batch_shape = features.shape[ensemble_dim:-1]
        else:
            batch_shape = features.shape[:-1]
        B = math.prod(batch_shape) if batch_shape else 1

        sub = _sublane_multiple(features.dtype)
        tm, B_pad = _pick_tile(B, self._tm_cap, sub)

        if ensemble_input:
            x = features.reshape(E, B, K)
            if (B_pad - B) or (self._K_pad - K):
                x = jnp.pad(x, ((0, 0), (0, B_pad - B), (0, self._K_pad - K)))
            out = _ensemble_matmul(
                x, self._w_ens, self._b_ens,
                tm=tm, tk=self._tk, tn=self._tn,
                out_dtype=features.dtype, mxu_dtype=self.mxu_dtype,
            )
            y = out[:, :B, :N]                       # (E, B, N)
        else:
            x = features.reshape(1, B, K)
            if (B_pad - B) or (self._K_pad - K):
                x = jnp.pad(x, ((0, 0), (0, B_pad - B), (0, self._K_pad - K)))
            out = _ensemble_matmul(
                x, self._w_shared, self._b_shared,
                tm=tm, tk=self._tk, tn=self._tn_s,
                out_dtype=features.dtype, mxu_dtype=self.mxu_dtype,
            )
            y = out[0, :B, :E * N].reshape(B, E, N)
            y = jnp.transpose(y, (1, 0, 2))          # (E, B, N)

        return y.reshape(ensemble_shape + batch_shape + (N,))


# ---------------------------------------------------------------------------
# Pure-JAX reference (matches the PyTorch forward semantics)
# ---------------------------------------------------------------------------

def _reference(features, weight, bias, ensemble_shape):
    ensemble_dim = len(ensemble_shape)
    ensemble_input = tuple(features.shape[:ensemble_dim]) == tuple(ensemble_shape)
    E = math.prod(ensemble_shape) if ensemble_shape else 1
    K, N = weight.shape[-2], weight.shape[-1]
    w = weight.reshape(E, K, N)
    if ensemble_input:
        batch_shape = features.shape[ensemble_dim:-1]
        x = features.reshape(E, -1, K)
        y = jnp.einsum("ebk,ekn->ebn", x, w)
    else:
        batch_shape = features.shape[:-1]
        x = features.reshape(-1, K)
        y = jnp.einsum("bk,ekn->ebn", x, w)
    if bias is not None:
        y = y + bias.reshape(E, 1, N)
    return y.reshape(tuple(ensemble_shape) + batch_shape + (N,))


if __name__ == "__main__":
    key = jax.random.PRNGKey(0)
    k_w, k_b, k_x1, k_x2, k_w2, k_b2, k_x3, k_x4 = jax.random.split(key, 8)

    config = {
        "device": "tpu",            # unused in the JAX/Pallas port
        "ensemble_shape": (3,),
        "float_dtype": jnp.float32,
    }
    in_features, out_features = 32, 20
    batch_shape = (2, 4)

    layer = Linear(config, in_features, out_features, bias=True, key=k_w)
    # Non-zero bias so the bias path is actually exercised; rebuild padded copies.
    layer.bias = 0.1 * jax.random.normal(k_b, layer.bias.shape, layer.bias.dtype)
    layer.refresh_parameters()

    # Case 1: ensemble input  (ensemble_shape + batch_shape + (in,))
    x_ens = jax.random.normal(k_x1, (3,) + batch_shape + (in_features,), jnp.float32)
    y_ens = layer(x_ens)

    # Case 2: shared input  (batch_shape + (in,))
    x_shared = jax.random.normal(k_x2, batch_shape + (in_features,), jnp.float32)
    y_shared = layer(x_shared)

    # Case 3/4: tiny tk_cap forces the K-reduction (accumulator) kernel path.
    layer2 = Linear(config, 256, 64, bias=True, key=k_w2, tk_cap=128)
    layer2.bias = 0.05 * jax.random.normal(k_b2, layer2.bias.shape, layer2.bias.dtype)
    layer2.refresh_parameters()
    x_ens2 = jax.random.normal(k_x3, (3, 8, 256), jnp.float32)
    x_shared2 = jax.random.normal(k_x4, (8, 256), jnp.float32)
    y_ens2 = layer2(x_ens2)
    y_shared2 = layer2(x_shared2)

    jax.block_until_ready((y_ens, y_shared, y_ens2, y_shared2))

    ref_ens = _reference(x_ens, layer.weight, layer.bias, (3,))
    ref_shared = _reference(x_shared, layer.weight, layer.bias, (3,))
    ref_ens2 = _reference(x_ens2, layer2.weight, layer2.bias, (3,))
    ref_shared2 = _reference(x_shared2, layer2.weight, layer2.bias, (3,))

    assert y_ens.shape == (3,) + batch_shape + (out_features,)
    assert y_shared.shape == (3,) + batch_shape + (out_features,)
    assert jnp.allclose(y_ens, ref_ens, rtol=1e-3, atol=1e-3)
    assert jnp.allclose(y_shared, ref_shared, rtol=1e-3, atol=1e-3)
    assert y_ens2.shape == (3, 8, 64)
    assert y_shared2.shape == (3, 8, 64)
    assert jnp.allclose(y_ens2, ref_ens2, rtol=1e-3, atol=1e-3)
    assert jnp.allclose(y_shared2, ref_shared2, rtol=1e-3, atol=1e-3)

    print("KERNEL_OK")
</pallas_src>

<mosaic_0001>
module attributes {stable_mosaic.version = 11 : i64} {
  func.func @_linear_kernel(%arg0: i32, %arg1: i32, %arg2: i32, %arg3: memref<1x8x128xf32, #tpu.memory_space<vmem>>, %arg4: memref<1x128x128xf32, #tpu.memory_space<vmem>>, %arg5: memref<1x1x128xf32, #tpu.memory_space<vmem>>, %arg6: memref<1x8x128xf32, #tpu.memory_space<vmem>>) attributes {dimension_semantics = [#tpu.dimension_semantics<parallel>, #tpu.dimension_semantics<parallel>, #tpu.dimension_semantics<parallel>], iteration_bounds = array<i64: 3, 1, 1>, scalar_prefetch = 0 : i64, scratch_operands = 0 : i64, tpu.core_type = #tpu.core_type<tc>, window_params = [{transform_indices = @transform_0, window_bounds = array<i64: 1, 8, 128>}, {transform_indices = @transform_1, window_bounds = array<i64: 1, 128, 128>}, {transform_indices = @transform_2, window_bounds = array<i64: 1, 1, 128>}, {transform_indices = @transform_3, window_bounds = array<i64: 1, 8, 128>}]} {
    %c0 = arith.constant 0 : index
    %c0_0 = arith.constant 0 : index
    %c0_1 = arith.constant 0 : index
    %0 = vector.load %arg3[%c0, %c0_0, %c0_1] : memref<1x8x128xf32, #tpu.memory_space<vmem>>, vector<1x8x128xf32>
    %1 = vector.shape_cast %0 : vector<1x8x128xf32> to vector<8x128xf32>
    %c0_2 = arith.constant 0 : index
    %c0_3 = arith.constant 0 : index
    %c0_4 = arith.constant 0 : index
    %2 = vector.load %arg4[%c0_2, %c0_3, %c0_4] : memref<1x128x128xf32, #tpu.memory_space<vmem>>, vector<1x128x128xf32>
    %3 = vector.shape_cast %2 : vector<1x128x128xf32> to vector<128x128xf32>
    %cst = arith.constant dense<0.000000e+00> : vector<8x128xf32>
    %4 = tpu.matmul %1, %3, %cst {dimension_numbers = #tpu.dot_dimension_numbers<[1], [0], [0], [1], [0, 0, 1, 1], [], []>} : vector<8x128xf32>, vector<128x128xf32>, vector<8x128xf32> -> vector<8x128xf32>
    %c0_5 = arith.constant 0 : index
    %c0_6 = arith.constant 0 : index
    %c0_7 = arith.constant 0 : index
    %5 = vector.load %arg5[%c0_5, %c0_6, %c0_7] : memref<1x1x128xf32, #tpu.memory_space<vmem>>, vector<1x1x128xf32>
    %6 = vector.shape_cast %5 : vector<1x1x128xf32> to vector<1x128xf32>
    %7 = vector.broadcast %6 : vector<1x128xf32> to vector<8x128xf32>
    %8 = arith.addf %4, %7 : vector<8x128xf32>
    %c0_8 = arith.constant 0 : index
    %c0_9 = arith.constant 0 : index
    %c0_10 = arith.constant 0 : index
    %9 = vector.load %arg6[%c0_8, %c0_9, %c0_10] : memref<1x8x128xf32, #tpu.memory_space<vmem>>, vector<1x8x128xf32>
    %10 = vector.shape_cast %9 : vector<1x8x128xf32> to vector<8x128xf32>
    %11 = vector.shape_cast %8 : vector<8x128xf32> to vector<1x8x128xf32>
    tpu.vector_store %arg6[%c0_8, %c0_9, %c0_10], %11 {strides = array<i32>} : memref<1x8x128xf32, #tpu.memory_space<vmem>>, vector<1x8x128xf32>,
    return
  }
  func.func @transform_0(%arg0: i32, %arg1: i32, %arg2: i32) -> (i32, i32, i32) {
    %c0_i32 = arith.constant 0 : i32
    %c0_i32_0 = arith.constant 0 : i32
    return %arg0, %arg1, %c0_i32 : i32, i32, i32
  }
  func.func @transform_1(%arg0: i32, %arg1: i32, %arg2: i32) -> (i32, i32, i32) {
    %c0_i32 = arith.constant 0 : i32
    %c0_i32_0 = arith.constant 0 : i32
    return %arg0, %c0_i32, %arg2 : i32, i32, i32
  }
  func.func @transform_2(%arg0: i32, %arg1: i32, %arg2: i32) -> (i32, i32, i32) {
    %c0_i32 = arith.constant 0 : i32
    %c0_i32_0 = arith.constant 0 : i32
    return %arg0, %c0_i32, %arg2 : i32, i32, i32
  }
  func.func @transform_3(%arg0: i32, %arg1: i32, %arg2: i32) -> (i32, i32, i32) {
    %c0_i32 = arith.constant 0 : i32
    return %arg0, %arg1, %arg2 : i32, i32, i32
  }
}

</mosaic_0001>

<bundles_post_ra>
// kernel: tpu_custom_call.1
= control target key start
LH: loop header
LB: loop body
LE: loop exit
PB: predicated region body
PF: predicated region fallthrough
CT: control target
= control target key end

     0   :  { %8 = vsyncpa [#allocation3], 0  ;;  %s1021_s0 = inlined_call_operand.hbm [shape: f32[3,8,128], index: 0, kind: input, shape index: {}]   ;;  %s1022_s1 = inlined_call_operand.hbm [shape: f32[3,128,128], index: 1, kind: input, shape index: {}]   ;;  %s1023_s2 = inlined_call_operand.vmem [shape: f32[3,1,128], index: 2, kind: input, shape index: {}]   ;;  %s1024_s3 = inlined_call_operand.hbm [shape: f32[3,8,128], index: 3, kind: output, shape index: {}]  }
   0x1   :  { %10 = vsyncpa [#allocation3 + $0x1], 0 }
   0x2   :  { %11 = vsyncpa [#allocation6], 0 }
   0x3   :  { %13 = vsyncpa [#allocation6 + $0x1], 0 }
   0x4   :  { %14 = vsyncpa [#allocation4], 0 }
   0x5   :  { %16 = vsyncpa [#allocation4 + $0x1], 0  ;;  %s823_s12 = smov 0   ;;  %s825_s13 = smov 0  }
   0x6   :  { %s827_s14 = smov 0   ;;  %s829_s15 = smov 0  }
   0x7   :  { %s831_s16 = smov 0   ;;  %s833_s17 = smov 0  }
   0x8 LB: > { %s512_s18 = sadd.s32 4294967295, %s794_s17   ;;  %s513_s19 = sadd.s32 4294967294, %s794_s17   ;;  %s794_s17 = sphi %s833_s17, %s22_s17   ;;  %s790_s16 = sphi %s831_s16, %s1035_s16   ;;  %s786_s15 = sphi %s829_s15, %s1034_s15   ;;  %s782_s14 = sphi %s827_s14, %s1033_s14   ;;  %s778_s13 = sphi %s825_s13, %s1032_s13   ;;  %s774_s12 = sphi %s823_s12, %s1031_s12  }
   0x9   : > { %s41_s20 = sadd.s32 1, %s790_s16  ;;  %s50_s21 = sadd.s32 1, %s782_s14 }
   0xa   : > { %p43_p0 = scmp.ge.s32.totalorder %s41_s20, 3  ;;  %p57_p1 = scmp.ne.s32.totalorder %s782_s14, %s778_s13 }
   0xb   : > { %p58_p2 = scmp.eq.s32.totalorder %s794_s17, 0  ;;  %p63_p3 = scmp.ne.s32.totalorder %s778_s13, %s774_s12 }
   0xc   : > { %s1037_s20 = smov (%p43_p0, %s41_s20), 0  ;;  %p64_p5 = scmp.eq.s32.totalorder %s512_s18, 0 }
   0xd   : > { %p864_p4 = por %p58_p2, %p57_p1  ;;  %s45_s23 = ssub.s32 %s790_s16, %s1037_s20 }
   0xe   : > { %p147_p6 = scmp.eq.s32.totalorder %s512_s18, 2  ;;  %p48_p7 = scmp.eq.s32.totalorder %s45_s23, 0 }
   0xf   : > { %p870_p8 = por %p64_p5, %p63_p3  ;;  %p153_p10 = scmp.eq.s32.totalorder %s513_s19, 2 }
  0x10   : > { %p874_p9 = por %p147_p6, %p57_p1  ;;  %p600_p12 = scmp.lt.s32.totalorder %s794_s17, 3 }
  0x11   : > { %s879_s26 = scalar_select %p48_p7, %s782_s14, %s50_s21  }
  0x12   : > { %p881_p11 = por %p153_p10, %p63_p3  ;;  %s887_s28 = sand.u32 1, %s782_s14  }
  0x13   : > { %s516_s29 = sshll.u32 %s887_s28, 3  ;;  %s517_s30 = sshll.u32 %s790_s16, 7 }
  0x14   : > { %s183_s6 = scalar_lea.hbm %s1021_s0, %s517_s30  ;;  %s177_s7 = scalar_lea.vmem [#allocation2], %s516_s29 }
  0x15   : > { %s185_s8 = sshll.u32 %s177_s7, 4  ;;  %p896_p13 = pnand %p600_p12, %p864_p4  ;;  %s186_s8 = int_to_ptr.vmem [resolvable:$true] %s185_s8 }
  0x16   : > { %p521_p0 = scmp.ge.s32.totalorder %s794_s17, 1  ;;  %p221_p1 = scmp.lt.s32.totalorder %s794_s17, 4 }
  0x17   : > { %s174_s10 = scalar_lea.sflag [#allocation3], %s887_s28  ;;  %p656_p2 = pneg %p896_p13 }
  0x18   : > { %s667_s11 = scalar_lea.vmem %s186_s8, 128  ;;  %s796_s18 = smov [#allocation2]  }
  0x19   : > { %p668_p3 = scmp.ne.s32.totalorder %s186_s8, %s667_s11  ;;  %s672_s19 = sshll.u32 %s796_s18, 4  ;;  %s673_s19 = int_to_ptr.vmem [resolvable:$false] %s672_s19 }
  0x1a   : > { %s674_s21 = scalar_lea.vmem %s673_s19, 256  ;;  %p675_p4 = scmp.lt.s32.totalorder %s186_s8, %s673_s19 }
  0x1b   : > { %p670_p5 = pnand %p668_p3, %p656_p2  ;;  %p676_p7 = scmp.lt.s32.totalorder %s674_s21, %s667_s11 }
  0x1d   : > { %p671_p6 = pneg %p670_p5  ;;  %p677_p10 = por %p676_p7, %p675_p4 }
  0x1f   : > { %p678_p12 = pnand %p677_p10, %p671_p6 }
  0x21   : > { %681 = shalt.err (!%p678_p12)
}
  0x22   : > { %592 = dma.hbm_to_vmem [thread:$0]  (!%p896_p13), %s183_s6, 128, %s186_s8, %s174_s10  }
  0x23   : > { %p914_p3 = pnand %p521_p0, %p221_p1  ;;  %s518_s23 = sshll.u32 %s887_s28, 7 }
  0x24   : > { %s530_s29 = sshll.u32 %s790_s16, 11  ;;  %s196_s7 = scalar_lea.vmem [#allocation5], %s518_s23 }
  0x25   : > { %s203_s5 = scalar_lea.hbm %s1022_s1, %s530_s29  ;;  %s204_s11 = sshll.u32 %s196_s7, 4  ;;  %s205_s11 = int_to_ptr.vmem [resolvable:$true] %s204_s11 }
  0x26   : > { %s193_s18 = scalar_lea.sflag [#allocation6], %s887_s28  ;;  %s695_s19 = scalar_lea.vmem %s205_s11, 2048 }
  0x27   : > { %p696_p5 = scmp.ne.s32.totalorder %s205_s11, %s695_s19  ;;  %s797_s6 = smov [#allocation5]  }
  0x28   : > { %s700_s8 = sshll.u32 %s797_s6, 4  ;;  %s701_s8 = int_to_ptr.vmem [resolvable:$false] %s700_s8 }
  0x29   : > { %p698_p6 = pnand %p696_p5, %p656_p2  ;;  %s702_s10 = scalar_lea.vmem %s701_s8, 4096 }
  0x2a   : > { %p703_p0 = scmp.lt.s32.totalorder %s205_s11, %s701_s8  ;;  %p704_p1 = scmp.lt.s32.totalorder %s702_s10, %s695_s19 }
  0x2b   : > { %p699_p4 = pneg %p698_p6 }
  0x2c   : > { %p705_p7 = por %p704_p1, %p703_p0 }
  0x2e   : > { %p706_p10 = pnand %p705_p7, %p699_p4 }
  0x30   : > { %709 = shalt.err (!%p706_p10)
}
  0x31   : > { %s798_s21 = smov 128   ;;  %s799_s23 = smov 8  }
  0x32   : > { %595 = dma.hbm_to_vmem [thread:$0]  (!%p896_p13), %s203_s5, 2048, %s205_s11, %s193_s18, %s798_s21, %s798_s21, %s799_s23  }
  0x33   : > { %225 = sbr.rel (%p914_p3) target bundleno = 301 (0x12d), region = 32  ;;  %s932_s28 = sand.u32 (!%p914_p3), 1, %s778_s13  }
  0x34   : > { %s522_s29 = sshll.u32 (!%p914_p3), %s932_s28, 3  ;;  %s228_s30 = scalar_lea.sflag (!%p914_p3), [#allocation3], %s932_s28 }
  0x35   : > { %s938_s4 = scalar_lea.vmem (!%p914_p3), [#allocation2], %s522_s29 }
  0x38   : > { %761 = dma.done.wait (%p870_p8), %s228_s30, 128  }
  0x39   : > { %763 = vsyncadd (%p870_p8), %s228_s30, 4294967168  ;;  %s523_s9 = sshll.u32 %s932_s28, 7  ;;  %s237_s22 = scalar_lea.sflag [#allocation6], %s932_s28 }
  0x3a   : > { %s946_s5 = scalar_lea.vmem [#allocation5], %s523_s9 }
  0x3b   : > { %765 = dma.done.wait (%p870_p8), %s237_s22, 2048  }
  0x3c   : > { %767 = vsyncadd (%p870_p8), %s237_s22, 4294965248  ;;  %v800_v0 = vmov 0.0   ;;  %vm801_vm0 = vmmov 0   ;;  %v296_v1 = vld [vmem:[%s946_s5 + $0x78] sm:$0xff]  ;;  %v295_v2 = vld [vmem:[%s946_s5 + $0x70] sm:$0xff]  ;;  %p274_p8 = scmp.lt.s32.totalorder %s786_s15, 2 }
  0x3d   : > { %548 = vmatprep.subr.mxu0 %v800_v0  ;;  %580 = vmatprep.mubr.msk.f32.mxu0 %vm801_vm0, %v800_v0  ;;  %v294_v3 = vld [vmem:[%s946_s5 + $0x68] sm:$0xff]  ;;  %v293_v4 = vld [vmem:[%s946_s5 + $0x60] sm:$0xff]  ;;  %v292_v5 = vld [vmem:[%s946_s5 + $0x58] sm:$0xff]  ;;  %s527_s19 = sshll.u32 %s786_s15, 7  ;;  %s273_s6 = scalar_lea.vmem [#allocation7], %s522_s29 }
  0x3e   : > { %549 = vmatpush3.msra.mxu0 %v296_v1  ;;  %v291_v6 = vld [vmem:[%s946_s5 + $0x50] sm:$0xff]  ;;  %v290_v7 = vld [vmem:[%s946_s5 + $0x48] sm:$0xff]  ;;  %v289_v8 = vld [vmem:[%s946_s5 + $0x40] sm:$0xff]  ;;  %s275_s24 = scalar_select %p274_p8, %s786_s15, 2 }
  0x3f   : > { %550 = vmatprep.subr.mxu0 %v800_v0  ;;  %v288_v9 = vld [vmem:[%s946_s5 + $0x38] sm:$0xff]  ;;  %v287_v10 = vld [vmem:[%s946_s5 + $0x30] sm:$0xff]  ;;  %v286_v11 = vld [vmem:[%s946_s5 + $0x28] sm:$0xff]  ;;  %s391_s8 = sshll.u32 %s273_s6, 4  ;;  %s980_s23 = scalar_lea.hbm %s1024_s3, %s527_s19  ;;  %s392_s8 = int_to_ptr.vmem [resolvable:$true] %s391_s8 }
  0x40   : > { %551 = vmatpush3.msra.mxu0 %v295_v2  ;;  %v285_v12 = vld [vmem:[%s946_s5 + $0x20] sm:$0xff]  ;;  %v284_v13 = vld [vmem:[%s946_s5 + $0x18] sm:$0xff]  ;;  %v283_v14 = vld [vmem:[%s946_s5 + $0x10] sm:$0xff]  ;;  %s279_s18 = scalar_lea.vmem %s1023_s2, %s275_s24  ;;  %s376_s30 = scalar_lea.sflag [#allocation4], %s932_s28 }
  0x41   : > { %552 = vmatprep.subr.mxu0 %v800_v0  ;;  %v282_v15 = vld [vmem:[%s946_s5 + $0x8] sm:$0xff]  ;;  %v281_v16 = vld [vmem:[%s946_s5] sm:$0xff]  ;;  %v280_v17 = vld [vmem:[%s938_s4] sm:$0xff]  ;;  %s710_s4 = scalar_lea.vmem %s392_s8, 128  ;;  %s802_s15 = smov [#allocation7]  }
  0x42   : > { %553 = vmatpush3.msra.mxu0 %v294_v3  ;;  %v525_v18 = vld [vmem:[%s279_s18] ss:$0 sm:$0xff]  ;;  %p711_p13 = scmp.ne.s32.totalorder %s392_s8, %s710_s4  ;;  %s714_s9 = sshll.u32 %s802_s15, 4  ;;  %s715_s9 = int_to_ptr.vmem [resolvable:$false] %s714_s9 }
  0x43   : > { %554 = vmatprep.subr.mxu0 %v800_v0  ;;  %s716_s29 = scalar_lea.vmem %s715_s9, 256  ;;  %p717_p3 = scmp.lt.s32.totalorder %s392_s8, %s715_s9 }
  0x44   : > { %555 = vmatpush3.msra.mxu0 %v293_v4  ;;  %p712_p2 = pnand %p711_p13, %p874_p9  ;;  %p718_p5 = scmp.lt.s32.totalorder %s716_s29, %s710_s4 }
  0x45   : > { %556 = vmatprep.subr.mxu0 %v800_v0 }
  0x46   : > { %557 = vmatpush3.msra.mxu0 %v292_v5  ;;  %p713_p12 = pneg %p712_p2  ;;  %p719_p6 = por %p718_p5, %p717_p3 }
  0x47   : > { %558 = vmatprep.subr.mxu0 %v800_v0 }
  0x48   : > { %559 = vmatpush3.msra.mxu0 %v291_v6  ;;  %p720_p4 = pnand %p719_p6, %p713_p12 }
  0x49   : > { %560 = vmatprep.subr.mxu0 %v800_v0 }
  0x4a   : > { %561 = vmatpush3.msra.mxu0 %v290_v7 }
  0x4b   : > { %562 = vmatprep.subr.mxu0 %v800_v0 }
  0x4c   : > { %563 = vmatpush3.msra.mxu0 %v289_v8 }
  0x4d   : > { %564 = vmatprep.subr.mxu0 %v800_v0 }
  0x4e   : > { %565 = vmatpush3.msra.mxu0 %v288_v9 }
  0x4f   : > { %566 = vmatprep.subr.mxu0 %v800_v0 }
  0x50   : > { %567 = vmatpush3.msra.mxu0 %v287_v10 }
  0x51   : > { %568 = vmatprep.subr.mxu0 %v800_v0 }
  0x52   : > { %569 = vmatpush3.msra.mxu0 %v286_v11 }
  0x53   : > { %570 = vmatprep.subr.mxu0 %v800_v0 }
  0x54   : > { %571 = vmatpush3.msra.mxu0 %v285_v12 }
  0x55   : > { %572 = vmatprep.subr.mxu0 %v800_v0 }
  0x56   : > { %573 = vmatpush3.msra.mxu0 %v284_v13 }
  0x57   : > { %574 = vmatprep.subr.mxu0 %v800_v0 }
  0x58   : > { %575 = vmatpush3.msra.mxu0 %v283_v14 }
  0x59   : > { %576 = vmatprep.subr.mxu0 %v800_v0 }
  0x5a   : > { %577 = vmatpush3.msra.mxu0 %v282_v15 }
  0x5b   : > { %578 = vmatprep.subr.mxu0 %v800_v0 }
  0x5c   : > { %579 = vmatpush3.msra.mxu0 %v281_v16 }
  0x5d   : > { %581 = vmatmul.mubr.f32.vlgmr.msra.gmra.mxu0 %v280_v17 }
 0x11d   : > { %v370_v19 = vpop.f32.mrf.mxu0 }
 0x11e   : > { %v371_v20 = vadd.f32 %v525_v18, %v370_v19 }
 0x11f   : > { %v582_v21 = vpop.f32.mrf.mxu0 }
 0x120   : > { %374 = vst [vmem:[%s273_s6] sm:$0xff] %v371_v20 }
 0x121   : > { %723 = shalt.err (!%p720_p4)
}
 0x122   : > { %s724_s22 = scalar_lea.hbm %s980_s23, 128  ;;  %s728_s24 = scalar_lea.hbm %s1024_s3, 384 }
 0x123   : > { %p725_p0 = scmp.ne.s32.totalorder %s980_s23, %s724_s22  ;;  %p729_p10 = scmp.lt.s32.totalorder %s980_s23, %s1024_s3 }
 0x124   : > { %p730_p8 = scmp.lt.s32.totalorder %s728_s24, %s724_s22 }
 0x125   : > { %p726_p1 = pnand %p725_p0, %p874_p9 }
 0x126   : > { %p731_p13 = por %p730_p8, %p729_p10 }
 0x127   : > { %p727_p7 = pneg %p726_p1 }
 0x129   : > { %p732_p2 = pnand %p731_p13, %p727_p7 }
 0x12b   : > { %735 = shalt.err (!%p732_p2)
}
 0x12c   : > { %587 = dma.vmem_to_hbm [thread:$0]  (%p874_p9), %s392_s8, 128, %s980_s23, %s376_s30  }
 0x12d PF: > { %p601_p12 = scmp.ge.s32.totalorder %s794_s17, 2  ;;  %s403_s18 = sand.u32 1, %s774_s12  }
 0x12e   : > { %s404_s19 = scalar_lea.sflag [#allocation4], %s403_s18 }
 0x12f   : > { %p597_p3 = pnand %p601_p12, %p881_p11 }
 0x131   : > { %p598_p5 = pneg %p597_p3 }
 0x133   : > { %769 = dma.done.wait (%p598_p5), %s404_s19, 128  }
 0x134   : > { %771 = vsyncadd (%p598_p5), %s404_s19, 4294967168  ;;  %s22_s17 = sadd.s32 1, %s794_s17   ;;  %s1031_s12 = smov %s778_s13 }
 0x135   : > { %p19_p6 = scmp.ge.s32.totalorder %s22_s17, 5   ;;  %s1032_s13 = smov %s782_s14 }
 0x136   : > { %s1033_s14 = smov %s879_s26  ;;  %s1034_s15 = smov %s790_s16 }
 0x137   : > { %s1035_s16 = smov %s1037_s20  ;;  %21 = sbr.rel (!%p19_p6) target bundleno = 8 (0x8), region = 93 }
 0x13c   :  { %409 = vsyncpa [#allocation3], 1 }
 0x13d   :  { %411 = vsyncpa [#allocation3 + $0x1], 1 }
 0x13e   :  { %412 = vsyncpa [#allocation6], 1 }
 0x13f   :  { %414 = vsyncpa [#allocation6 + $0x1], 1 }
 0x140   :  { %415 = vsyncpa [#allocation4], 1 }
 0x141   :  { %417 = vsyncpa [#allocation4 + $0x1], 1 }

</bundles_post_ra>
